<compile_context>
chip_gen: v7x
topology: tpu7x:2x2x1
jax: 0.10.0
libtpu: 0.0.40
codegen_flags: <defaults>
</compile_context>

<pallas_src>
import functools

import jax
import jax.numpy as jnp
from jax.experimental import pallas as pl
from jax.experimental.pallas import tpu as pltpu


def _graphconv_kernel(adj_ref, feat_ref, w_ref, out_ref, *, apply_relu):
    # (adj_tile @ feat): bf16 operands, f32 accumulation on the MXU.
    af = jnp.dot(adj_ref[...], feat_ref[...], preferred_element_type=jnp.float32)
    # Tiny (TM, F) @ (F, W) projection: keep it f32 (weights resident in f32),
    # so only adj / x / h ever get truncated to bf16.
    y = jnp.dot(af, w_ref[...], preferred_element_type=jnp.float32)
    if apply_relu:
        y = jnp.maximum(y, 0.0)
    out_ref[...] = y.astype(out_ref.dtype)


def _choose_row_tile(n):
    """Largest row tile that (a) divides n, (b) is a multiple of 128 where
    possible, (c) keeps a bf16 (tm, n) adj tile <= ~8 MiB so the double-
    buffered adj stream fits comfortably inside v7x's 64 MiB VMEM."""
    if n % 128 != 0:
        return n                               # small / irregular: single whole-array block
    budget_rows = (8 << 20) // (2 * n)         # rows per <= 8 MiB bf16 tile
    tm = min(n, 512, max(128, (budget_rows // 128) * 128))
    while n % tm:
        tm -= 128
    return tm


def _graphconv(adj_b, feat_b, w, *, apply_relu, out_dtype):
    """out = [relu](adj @ feat @ W), adj streamed in row tiles, feat/W resident."""
    n = adj_b.shape[0]
    fd = feat_b.shape[1]
    wd = w.shape[1]
    tm = _choose_row_tile(n)
    nt = n // tm
    out_isize = jnp.dtype(out_dtype).itemsize

    # Explicit scoped-VMEM budget: every operand counted double-buffered + headroom.
    vmem_bytes = int(2 * tm * n * 2                          # adj row tiles (bf16)
                     + 2 * n * fd * feat_b.dtype.itemsize    # resident feat
                     + 2 * fd * wd * 4                       # resident weights (f32)
                     + 2 * tm * wd * out_isize               # output tiles
                     + (8 << 20))                            # compiler scratch headroom

    flops = 2 * n * n * fd + 2 * n * fd * wd
    bytes_accessed = int(n * n * 2                           # one adj pass for this layer
                         + n * fd * feat_b.dtype.itemsize
                         + fd * wd * 4
                         + n * wd * out_isize)

    return pl.pallas_call(
        functools.partial(_graphconv_kernel, apply_relu=apply_relu),
        out_shape=jax.ShapeDtypeStruct((n, wd), out_dtype),
        grid_spec=pltpu.PrefetchScalarGridSpec(
            num_scalar_prefetch=0,
            grid=(nt,),
            in_specs=[
                pl.BlockSpec((tm, n), lambda i: (i, 0)),     # adj: streamed row tiles
                pl.BlockSpec((n, fd), lambda i: (0, 0)),     # feat (x or h): resident
                pl.BlockSpec((fd, wd), lambda i: (0, 0)),    # weights: resident
            ],
            out_specs=pl.BlockSpec((tm, wd), lambda i: (i, 0)),
        ),
        compiler_params=pltpu.CompilerParams(
            dimension_semantics=("parallel",),               # shard row tiles across TCs (v7x)
            vmem_limit_bytes=vmem_bytes),
        cost_estimate=pl.CostEstimate(flops=flops, transcendentals=0,
                                      bytes_accessed=bytes_accessed),
    )(adj_b, feat_b, w)


def gnnq_prepare(adj, w1, w2):
    """One-time (per-graph / per-parameter) preprocessing, kept out of the hot path:
    bf16 adj, f32 weights, W2 zero-padded to a lane-dense 128-wide class dim."""
    c = w2.shape[1]
    c_pad = ((c + 127) // 128) * 128
    adj_b = adj.astype(jnp.bfloat16)
    w1_f = w1.astype(jnp.float32)
    w2_p = jnp.zeros((w2.shape[0], c_pad), jnp.float32).at[:, :c].set(
        w2.astype(jnp.float32))
    return adj_b, w1_f, w2_p


@functools.partial(jax.jit, static_argnames=("num_class",))
def gnnq_forward(x, adj_b, w1, w2_p, *, num_class):
    # Eval-mode forward: both dropouts are identity.
    x_b = x.astype(jnp.bfloat16)
    # Layer 1: h = relu(adj @ x @ W1); h is a tiny (N, H) bf16 HBM round-trip.
    h = _graphconv(adj_b, x_b, w1, apply_relu=True, out_dtype=jnp.bfloat16)
    # Layer 2: logits = adj @ h @ W2 (padded lane-dense); slice real classes out.
    logits = _graphconv(adj_b, h, w2_p, apply_relu=False, out_dtype=jnp.float32)
    return logits[:, :num_class]


def reference(x, adj, w1, w2):
    h = jnp.maximum(adj @ (x @ w1), 0.0)
    return adj @ (h @ w2)


if __name__ == "__main__":
    # small shapes consistent with the module:
    #   N nodes = 128, num_feature = 32, hidden_dim = 32, num_class = 16
    N, Fdim, Hdim, Cdim = 128, 32, 32, 16

    key = jax.random.PRNGKey(0)
    kx, kadj, kw1, kw2 = jax.random.split(key, 4)

    # node features
    x = jax.random.normal(kx, (N, Fdim), dtype=jnp.float32)

    # dense symmetric row-normalized adjacency with self-loops (deterministic)
    a = (jax.random.uniform(kadj, (N, N)) < 0.05).astype(jnp.float32)
    a = jnp.maximum(a, a.T) + jnp.eye(N, dtype=jnp.float32)
    adj = a / jnp.sum(a, axis=1, keepdims=True)

    # GraphConvolution.reset_parameters: uniform(-1/sqrt(out), 1/sqrt(out))
    stdv1 = 1.0 / (Hdim ** 0.5)
    stdv2 = 1.0 / (Cdim ** 0.5)
    w1 = jax.random.uniform(kw1, (Fdim, Hdim), minval=-stdv1, maxval=stdv1,
                            dtype=jnp.float32)
    w2 = jax.random.uniform(kw2, (Hdim, Cdim), minval=-stdv2, maxval=stdv2,
                            dtype=jnp.float32)

    # One-time setup (per graph / per parameter set) -- not in the per-call path.
    adj_b, w1_f, w2_p = gnnq_prepare(adj, w1, w2)

    out = gnnq_forward(x, adj_b, w1_f, w2_p, num_class=Cdim)
    out = jax.block_until_ready(out)

    ref = reference(x, adj, w1, w2)
    assert out.shape == (N, Cdim)
    # bf16 adj/x/h on the MXU (f32 accumulation) -> loosened tolerance vs. pure-f32 ref.
    assert jnp.allclose(out, ref, atol=2e-2, rtol=2e-2)

    print("KERNEL_OK")
</pallas_src>

<mosaic_0001>
module attributes {stable_mosaic.version = 11 : i64} {
  func.func @_graphconv_kernel(%arg0: i32, %arg1: memref<128x128xbf16, #tpu.memory_space<vmem>>, %arg2: memref<128x32xbf16, #tpu.memory_space<vmem>>, %arg3: memref<32x128xf32, #tpu.memory_space<vmem>>, %arg4: memref<128x128xf32, #tpu.memory_space<vmem>>) attributes {dimension_semantics = [#tpu.dimension_semantics<parallel>], iteration_bounds = array<i64: 1>, scalar_prefetch = 0 : i64, scratch_operands = 0 : i64, tpu.core_type = #tpu.core_type<tc>, window_params = [{transform_indices = @transform_0, window_bounds = array<i64: 128, 128>}, {pipeline_mode = #tpu.pipeline_mode<synchronous>, transform_indices = @transform_1, window_bounds = array<i64: 128, 32>}, {pipeline_mode = #tpu.pipeline_mode<synchronous>, transform_indices = @transform_2, window_bounds = array<i64: 32, 128>}, {transform_indices = @transform_3, window_bounds = array<i64: 128, 128>}]} {
    %c0 = arith.constant 0 : index
    %c0_0 = arith.constant 0 : index
    %0 = vector.load %arg1[%c0, %c0_0] : memref<128x128xbf16, #tpu.memory_space<vmem>>, vector<128x128xbf16>
    %c0_1 = arith.constant 0 : index
    %c0_2 = arith.constant 0 : index
    %1 = vector.load %arg2[%c0_1, %c0_2] : memref<128x32xbf16, #tpu.memory_space<vmem>>, vector<128x32xbf16>
    %cst = arith.constant dense<0.000000e+00> : vector<128x32xf32>
    %2 = tpu.matmul %0, %1, %cst {dimension_numbers = #tpu.dot_dimension_numbers<[1], [0], [0], [1], [0, 0, 1, 1], [], []>} : vector<128x128xbf16>, vector<128x32xbf16>, vector<128x32xf32> -> vector<128x32xf32>
    %c0_3 = arith.constant 0 : index
    %c0_4 = arith.constant 0 : index
    %3 = vector.load %arg3[%c0_3, %c0_4] : memref<32x128xf32, #tpu.memory_space<vmem>>, vector<32x128xf32>
    %cst_5 = arith.constant dense<0.000000e+00> : vector<128x128xf32>
    %4 = tpu.matmul %2, %3, %cst_5 {dimension_numbers = #tpu.dot_dimension_numbers<[1], [0], [0], [1], [0, 0, 1, 1], [], []>} : vector<128x32xf32>, vector<32x128xf32>, vector<128x128xf32> -> vector<128x128xf32>
    %c0_6 = arith.constant 0 : index
    %c0_7 = arith.constant 0 : index
    %5 = vector.load %arg4[%c0_6, %c0_7] : memref<128x128xf32, #tpu.memory_space<vmem>>, vector<128x128xf32>
    tpu.vector_store %arg4[%c0_6, %c0_7], %4 {strides = array<i32>} : memref<128x128xf32, #tpu.memory_space<vmem>>, vector<128x128xf32>,
    return
  }
  func.func @transform_0(%arg0: i32) -> (i32, i32) {
    %c0_i32 = arith.constant 0 : i32
    %c0_i32_0 = arith.constant 0 : i32
    return %arg0, %c0_i32 : i32, i32
  }
  func.func @transform_1(%arg0: i32) -> (i32, i32) {
    %c0_i32 = arith.constant 0 : i32
    %c0_i32_0 = arith.constant 0 : i32
    %c0_i32_1 = arith.constant 0 : i32
    return %c0_i32, %c0_i32_0 : i32, i32
  }
  func.func @transform_2(%arg0: i32) -> (i32, i32) {
    %c0_i32 = arith.constant 0 : i32
    %c0_i32_0 = arith.constant 0 : i32
    %c0_i32_1 = arith.constant 0 : i32
    return %c0_i32, %c0_i32_0 : i32, i32
  }
  func.func @transform_3(%arg0: i32) -> (i32, i32) {
    %c0_i32 = arith.constant 0 : i32
    %c0_i32_0 = arith.constant 0 : i32
    return %arg0, %c0_i32 : i32, i32
  }
}

module attributes {stable_mosaic.version = 11 : i64} {
  func.func @_graphconv_kernel(%arg0: i32, %arg1: memref<128x128xbf16, #tpu.memory_space<vmem>>, %arg2: memref<128x32xbf16, #tpu.memory_space<vmem>>, %arg3: memref<32x32xf32, #tpu.memory_space<vmem>>, %arg4: memref<128x32xbf16, #tpu.memory_space<vmem>>) attributes {dimension_semantics = [#tpu.dimension_semantics<parallel>], iteration_bounds = array<i64: 1>, scalar_prefetch = 0 : i64, scratch_operands = 0 : i64, tpu.core_type = #tpu.core_type<tc>, window_params = [{transform_indices = @transform_0, window_bounds = array<i64: 128, 128>}, {pipeline_mode = #tpu.pipeline_mode<synchronous>, transform_indices = @transform_1, window_bounds = array<i64: 128, 32>}, {pipeline_mode = #tpu.pipeline_mode<synchronous>, transform_indices = @transform_2, window_bounds = array<i64: 32, 32>}, {transform_indices = @transform_3, window_bounds = array<i64: 128, 32>}]} {
    %c0 = arith.constant 0 : index
    %c0_0 = arith.constant 0 : index
    %0 = vector.load %arg1[%c0, %c0_0] : memref<128x128xbf16, #tpu.memory_space<vmem>>, vector<128x128xbf16>
    %c0_1 = arith.constant 0 : index
    %c0_2 = arith.constant 0 : index
    %1 = vector.load %arg2[%c0_1, %c0_2] : memref<128x32xbf16, #tpu.memory_space<vmem>>, vector<128x32xbf16>
    %cst = arith.constant dense<0.000000e+00> : vector<128x32xf32>
    %2 = tpu.matmul %0, %1, %cst {dimension_numbers = #tpu.dot_dimension_numbers<[1], [0], [0], [1], [0, 0, 1, 1], [], []>} : vector<128x128xbf16>, vector<128x32xbf16>, vector<128x32xf32> -> vector<128x32xf32>
    %c0_3 = arith.constant 0 : index
    %c0_4 = arith.constant 0 : index
    %3 = vector.load %arg3[%c0_3, %c0_4] : memref<32x32xf32, #tpu.memory_space<vmem>>, vector<32x32xf32>
    %cst_5 = arith.constant dense<0.000000e+00> : vector<128x32xf32>
    %4 = tpu.matmul %2, %3, %cst_5 {dimension_numbers = #tpu.dot_dimension_numbers<[1], [0], [0], [1], [0, 0, 1, 1], [], []>} : vector<128x32xf32>, vector<32x32xf32>, vector<128x32xf32> -> vector<128x32xf32>
    %cst_6 = arith.constant 0.000000e+00 : f32
    %5 = vector.broadcast %cst_6 : f32 to vector<128x32xf32>
    %6 = arith.maximumf %4, %5 : vector<128x32xf32>
    %7 = arith.truncf %6 : vector<128x32xf32> to vector<128x32xbf16>
    %c0_7 = arith.constant 0 : index
    %c0_8 = arith.constant 0 : index
    %8 = vector.load %arg4[%c0_7, %c0_8] : memref<128x32xbf16, #tpu.memory_space<vmem>>, vector<128x32xbf16>
    tpu.vector_store %arg4[%c0_7, %c0_8], %7 {strides = array<i32>} : memref<128x32xbf16, #tpu.memory_space<vmem>>, vector<128x32xbf16>,
    return
  }
  func.func @transform_0(%arg0: i32) -> (i32, i32) {
    %c0_i32 = arith.constant 0 : i32
    %c0_i32_0 = arith.constant 0 : i32
    return %arg0, %c0_i32 : i32, i32
  }
  func.func @transform_1(%arg0: i32) -> (i32, i32) {
    %c0_i32 = arith.constant 0 : i32
    %c0_i32_0 = arith.constant 0 : i32
    %c0_i32_1 = arith.constant 0 : i32
    return %c0_i32, %c0_i32_0 : i32, i32
  }
  func.func @transform_2(%arg0: i32) -> (i32, i32) {
    %c0_i32 = arith.constant 0 : i32
    %c0_i32_0 = arith.constant 0 : i32
    %c0_i32_1 = arith.constant 0 : i32
    return %c0_i32, %c0_i32_0 : i32, i32
  }
  func.func @transform_3(%arg0: i32) -> (i32, i32) {
    %c0_i32 = arith.constant 0 : i32
    %c0_i32_0 = arith.constant 0 : i32
    return %arg0, %c0_i32 : i32, i32
  }
}

</mosaic_0001>

<bundles_post_ra>
// kernel: gnnq_forward.3
= control target key start
LH: loop header
LB: loop body
LE: loop exit
PB: predicated region body
PF: predicated region fallthrough
CT: control target
= control target key end

     0   :  { %vm244_vm0 = vcmask 261120   ;;  %s758_s1 = inlined_call_operand.vmem [shape: bf16[128,32], index: 1, kind: input, shape index: {}]   ;;  %s759_s0 = inlined_call_operand.vmem [shape: bf16[128,128], index: 0, kind: input, shape index: {}]   ;;  %s760_s2 = inlined_call_operand.vmem [shape: f32[32,128], index: 2, kind: input, shape index: {}]   ;;  %s761_s3 = inlined_call_operand.vmem [shape: f32[128,128], index: 3, kind: output, shape index: {}]  }
   0x1   :  { %v598_v0 = vld [vmem:[%s758_s1] sm:$0xff]   ;;  %v599_v1 = vld [vmem:[%s758_s1 + $0x8] sm:$0xff]   ;;  %v600_v2 = vld [vmem:[%s758_s1 + $0x10] sm:$0xff]  }
   0x2   :  { %526 = vmatprep.subr.bf16.mxu0 %v598_v0  ;;  %v601_v3 = vld [vmem:[%s758_s1 + $0x18] sm:$0xff]   ;;  %v606_v4 = vld [vmem:[%s759_s0] sm:$0xff]   ;;  %v603_v6 = vld [vmem:[%s758_s1 + $0x28] sm:$0xff]  }
   0x3   :  { %527 = vmatpush3.bf16.msra.mxu0 %v598_v0  ;;  %542 = vmatprep.mubr.bf16.mxu0 %v606_v4  ;;  %v602_v5 = vld [vmem:[%s758_s1 + $0x20] sm:$0xff]   ;;  %v241_v8 = vld [vmem:[%s760_s2 + $0x8] sm:$0xff]  ;;  %v604_v10 = vld [vmem:[%s758_s1 + $0x30] sm:$0xff]  }
   0x4   :  { %528 = vmatprep.subr.bf16.mxu0 %v599_v1  ;;  %v240_v7 = vld [vmem:[%s760_s2] sm:$0xff]  ;;  %v605_v11 = vld [vmem:[%s758_s1 + $0x38] sm:$0xff]   ;;  %v607_v12 = vld [vmem:[%s759_s0 + $0x8] sm:$0xff]  }
   0x5   :  { %v590_v9 = vpack.c.bf16 %v241_v8, %v240_v7  ;;  %v608_v13 = vld [vmem:[%s759_s0 + $0x10] sm:$0xff]   ;;  %v609_v14 = vld [vmem:[%s759_s0 + $0x18] sm:$0xff]   ;;  %v610_v15 = vld [vmem:[%s759_s0 + $0x20] sm:$0xff]  }
   0x6   :  { %v611_v16 = vld [vmem:[%s759_s0 + $0x28] sm:$0xff]   ;;  %v612_v17 = vld [vmem:[%s759_s0 + $0x30] sm:$0xff]   ;;  %v613_v18 = vld [vmem:[%s759_s0 + $0x38] sm:$0xff]  }
   0x7   :  { %529 = vmatpush3.bf16.msra.mxu0 %v599_v1  ;;  %591 = vmatprep.subr.bf16.mxu1 %v590_v9  ;;  %v242_v19 = vld [vmem:[%s760_s2 + $0x10] sm:$0xff]  ;;  %v243_v20 = vld [vmem:[%s760_s2 + $0x18] sm:$0xff] }
   0x8   :  { %530 = vmatprep.subr.bf16.mxu0 %v600_v2  ;;  %593 = vmatpush3.bf16.msra.mxu1 %v590_v9  ;;  %v594_v21 = vpack.c.bf16 %v243_v20, %v242_v19 }
   0xa   :  { %595 = vmatprep.subr.bf16.mxu1 %v594_v21 }
   0xb   :  { %531 = vmatpush3.bf16.msra.mxu0 %v600_v2 }
   0xc   :  { %532 = vmatprep.subr.bf16.mxu0 %v601_v3  ;;  %597 = vmatpush3.bf16.msra.mxu1 %v594_v21 }
   0xf   :  { %533 = vmatpush3.bf16.msra.mxu0 %v601_v3 }
  0x10   :  { %534 = vmatprep.subr.bf16.mxu0 %v602_v5 }
  0x13   :  { %535 = vmatpush3.bf16.msra.mxu0 %v602_v5 }
  0x14   :  { %536 = vmatprep.subr.bf16.mxu0 %v603_v6 }
  0x17   :  { %537 = vmatpush3.bf16.msra.mxu0 %v603_v6 }
  0x18   :  { %538 = vmatprep.subr.bf16.mxu0 %v604_v10 }
  0x1b   :  { %539 = vmatpush3.bf16.msra.mxu0 %v604_v10 }
  0x1c   :  { %540 = vmatprep.subr.bf16.mxu0 %v605_v11 }
  0x1f   :  { %541 = vmatpush3.bf16.msra.mxu0 %v605_v11 }
  0x22   :  { %543 = vmatmul.mubr.bf16.vlgmr.msra.gmra.mrb[0].mxu0 %v607_v12 }
  0x23   :  { %546 = vmatprep.mubr.bf16.mxu0 %v608_v13 }
  0x2a   :  { %547 = vmatmul.mubr.bf16.gmra.mrb[4].mxu0 %v609_v14 }
  0x2b   :  { %550 = vmatprep.mubr.bf16.mxu0 %v610_v15 }
  0x32   :  { %551 = vmatmul.mubr.bf16.gmra.mrb[8].mxu0 %v611_v16 }
  0x33   :  { %554 = vmatprep.mubr.bf16.mxu0 %v612_v17 }
  0x3a   :  { %555 = vmatmul.mubr.bf16.gmra.mrb[12].mxu0 %v613_v18 }
  0xf5   :  { %v544_v22 = vpop.f32.mrb[0].mxu0 }
  0xf6   :  { %v177_v23 = vpop.f32.mrb[1].mxu0 }
  0xf7   :  { %v545_v24 = vpop.f32.mrb[2].mxu0  ;;  %566 = vmatprep.mubr.msk.f32.mxu1 %vm244_vm0, %v177_v23 }
  0xf8   :  { %v180_v25 = vpop.f32.mrb[3].mxu0 }
  0xf9   :  { %567 = vmatmul.mubr.msk.f32.vlgmr.msra.gmra.mrb[0].mxu1 %vm244_vm0, %v180_v25 }
  0xfa   :  { %569 = vmatprep.mubr.msk.f32.mxu1 %vm244_vm0, %v544_v22 }
  0xfd   :  { %v548_v26 = vpop.f32.mrb[4].mxu0  ;;  %570 = vmatmul.mubr.msk.f32.gmra.mrb[2].mxu1 %vm244_vm0, %v545_v24 }
  0xfe   :  { %v193_v27 = vpop.f32.mrb[5].mxu0 }
  0xff   :  { %v549_v28 = vpop.f32.mrb[6].mxu0  ;;  %572 = vmatprep.mubr.msk.f32.mxu1 %vm244_vm0, %v193_v27 }
 0x100   :  { %v196_v29 = vpop.f32.mrb[7].mxu0 }
 0x101   :  { %573 = vmatmul.mubr.msk.f32.gmra.mrb[4].mxu1 %vm244_vm0, %v196_v29 }
 0x102   :  { %575 = vmatprep.mubr.msk.f32.mxu1 %vm244_vm0, %v548_v26 }
 0x105   :  { %v552_v30 = vpop.f32.mrb[8].mxu0  ;;  %576 = vmatmul.mubr.msk.f32.gmra.mrb[6].mxu1 %vm244_vm0, %v549_v28 }
 0x106   :  { %v209_v31 = vpop.f32.mrb[9].mxu0 }
 0x107   :  { %v553_v32 = vpop.f32.mrb[10].mxu0  ;;  %578 = vmatprep.mubr.msk.f32.mxu1 %vm244_vm0, %v209_v31 }
 0x108   :  { %v212_v33 = vpop.f32.mrb[11].mxu0 }
 0x109   :  { %579 = vmatmul.mubr.msk.f32.gmra.mrb[8].mxu1 %vm244_vm0, %v212_v33 }
 0x10a   :  { %581 = vmatprep.mubr.msk.f32.mxu1 %vm244_vm0, %v552_v30 }
 0x10d   :  { %v556_v34 = vpop.f32.mrb[12].mxu0  ;;  %582 = vmatmul.mubr.msk.f32.gmra.mrb[10].mxu1 %vm244_vm0, %v553_v32 }
 0x10e   :  { %v225_v35 = vpop.f32.mrb[13].mxu0 }
 0x10f   :  { %v557_v36 = vpop.f32.mrb[14].mxu0  ;;  %584 = vmatprep.mubr.msk.f32.mxu1 %vm244_vm0, %v225_v35 }
 0x110   :  { %v228_v37 = vpop.f32.mrb[15].mxu0 }
 0x111   :  { %585 = vmatmul.mubr.msk.f32.gmra.mrb[12].mxu1 %vm244_vm0, %v228_v37 }
 0x112   :  { %587 = vmatprep.mubr.msk.f32.mxu1 %vm244_vm0, %v556_v34 }
 0x115   :  { %588 = vmatmul.mubr.msk.f32.gmra.mrb[14].mxu1 %vm244_vm0, %v557_v36 }
 0x1cc   :  { %v568_v38 = vpop.f32.mrb[0].mxu1 }
 0x1cd   :  { %439 = vst [vmem:[%s761_s3 + $0x8] sm:$0xff] %v568_v38  ;;  %v359_v39 = vpop.f32.mrb[1].mxu1 }
 0x1ce   :  { %438 = vst [vmem:[%s761_s3] sm:$0xff] %v359_v39 }
 0x1d0   :  { %v571_v40 = vpop.f32.mrb[2].mxu1 }
 0x1d1   :  { %441 = vst [vmem:[%s761_s3 + $0x18] sm:$0xff] %v571_v40  ;;  %v369_v41 = vpop.f32.mrb[3].mxu1 }
 0x1d2   :  { %440 = vst [vmem:[%s761_s3 + $0x10] sm:$0xff] %v369_v41 }
 0x1d4   :  { %v574_v42 = vpop.f32.mrb[4].mxu1 }
 0x1d5   :  { %443 = vst [vmem:[%s761_s3 + $0x28] sm:$0xff] %v574_v42  ;;  %v379_v43 = vpop.f32.mrb[5].mxu1 }
 0x1d6   :  { %442 = vst [vmem:[%s761_s3 + $0x20] sm:$0xff] %v379_v43 }
 0x1d8   :  { %v577_v44 = vpop.f32.mrb[6].mxu1 }
 0x1d9   :  { %445 = vst [vmem:[%s761_s3 + $0x38] sm:$0xff] %v577_v44  ;;  %v389_v45 = vpop.f32.mrb[7].mxu1 }
 0x1da   :  { %444 = vst [vmem:[%s761_s3 + $0x30] sm:$0xff] %v389_v45 }
 0x1dc   :  { %v580_v46 = vpop.f32.mrb[8].mxu1 }
 0x1dd   :  { %447 = vst [vmem:[%s761_s3 + $0x48] sm:$0xff] %v580_v46  ;;  %v399_v47 = vpop.f32.mrb[9].mxu1 }
 0x1de   :  { %446 = vst [vmem:[%s761_s3 + $0x40] sm:$0xff] %v399_v47 }
 0x1e0   :  { %v583_v48 = vpop.f32.mrb[10].mxu1 }
 0x1e1   :  { %449 = vst [vmem:[%s761_s3 + $0x58] sm:$0xff] %v583_v48  ;;  %v409_v49 = vpop.f32.mrb[11].mxu1 }
 0x1e2   :  { %448 = vst [vmem:[%s761_s3 + $0x50] sm:$0xff] %v409_v49 }
 0x1e4   :  { %v586_v50 = vpop.f32.mrb[12].mxu1 }
 0x1e5   :  { %451 = vst [vmem:[%s761_s3 + $0x68] sm:$0xff] %v586_v50  ;;  %v419_v51 = vpop.f32.mrb[13].mxu1 }
 0x1e6   :  { %450 = vst [vmem:[%s761_s3 + $0x60] sm:$0xff] %v419_v51 }
 0x1e8   :  { %v589_v52 = vpop.f32.mrb[14].mxu1 }
 0x1e9   :  { %453 = vst [vmem:[%s761_s3 + $0x78] sm:$0xff] %v589_v52  ;;  %v429_v53 = vpop.f32.mrb[15].mxu1 }
 0x1ea   :  { %452 = vst [vmem:[%s761_s3 + $0x70] sm:$0xff] %v429_v53 }

// kernel: gnnq_forward.2
= control target key start
LH: loop header
LB: loop body
LE: loop exit
PB: predicated region body
PF: predicated region fallthrough
CT: control target
= control target key end

     0   :  { %vm244_vm0 = vcmask 261120   ;;  %vm518_vm1 = vcmask 257024   ;;  %s887_s1 = inlined_call_operand.vmem [shape: bf16[128,32], index: 1, kind: input, shape index: {}]   ;;  %s888_s0 = inlined_call_operand.vmem [shape: bf16[128,128], index: 0, kind: input, shape index: {}]   ;;  %s889_s2 = inlined_call_operand.vmem [shape: f32[32,32], index: 2, kind: input, shape index: {}]   ;;  %s890_s3 = inlined_call_operand.vmem [shape: bf16[128,32], index: 3, kind: output, shape index: {}]  }
   0x1   :  { %v711_v0 = vld [vmem:[%s887_s1] sm:$0xff]   ;;  %v712_v1 = vld [vmem:[%s887_s1 + $0x8] sm:$0xff]   ;;  %v713_v2 = vld [vmem:[%s887_s1 + $0x10] sm:$0xff]  }
   0x2   :  { %639 = vmatprep.subr.bf16.mxu0 %v711_v0  ;;  %v714_v3 = vld [vmem:[%s887_s1 + $0x18] sm:$0xff]   ;;  %v719_v4 = vld [vmem:[%s888_s0] sm:$0xff]   ;;  %v716_v6 = vld [vmem:[%s887_s1 + $0x28] sm:$0xff]  }
   0x3   :  { %640 = vmatpush3.bf16.msra.mxu0 %v711_v0  ;;  %655 = vmatprep.mubr.bf16.mxu0 %v719_v4  ;;  %v715_v5 = vld [vmem:[%s887_s1 + $0x20] sm:$0xff]   ;;  %v241_v8 = vld [vmem:[%s889_s2 + $0x8] sm:$0xff]  ;;  %v717_v10 = vld [vmem:[%s887_s1 + $0x30] sm:$0xff]  }
   0x4   :  { %641 = vmatprep.subr.bf16.mxu0 %v712_v1  ;;  %v240_v7 = vld [vmem:[%s889_s2] sm:$0xff]  ;;  %v718_v11 = vld [vmem:[%s887_s1 + $0x38] sm:$0xff]   ;;  %v720_v12 = vld [vmem:[%s888_s0 + $0x8] sm:$0xff]  }
   0x5   :  { %v703_v9 = vpack.c.bf16 %v241_v8, %v240_v7  ;;  %v721_v13 = vld [vmem:[%s888_s0 + $0x10] sm:$0xff]   ;;  %v722_v14 = vld [vmem:[%s888_s0 + $0x18] sm:$0xff]   ;;  %v723_v15 = vld [vmem:[%s888_s0 + $0x20] sm:$0xff]  }
   0x6   :  { %v724_v16 = vld [vmem:[%s888_s0 + $0x28] sm:$0xff]   ;;  %v725_v17 = vld [vmem:[%s888_s0 + $0x30] sm:$0xff]   ;;  %v726_v18 = vld [vmem:[%s888_s0 + $0x38] sm:$0xff]  }
   0x7   :  { %642 = vmatpush3.bf16.msra.mxu0 %v712_v1  ;;  %704 = vmatprep.subr.bf16.mxu1 %v703_v9  ;;  %v242_v19 = vld [vmem:[%s889_s2 + $0x10] sm:$0xff]  ;;  %v243_v20 = vld [vmem:[%s889_s2 + $0x18] sm:$0xff] }
   0x8   :  { %643 = vmatprep.subr.bf16.mxu0 %v713_v2  ;;  %706 = vmatpush3.bf16.msra.mxu1 %v703_v9  ;;  %v707_v21 = vpack.c.bf16 %v243_v20, %v242_v19 }
   0xa   :  { %708 = vmatprep.subr.bf16.mxu1 %v707_v21 }
   0xb   :  { %644 = vmatpush3.bf16.msra.mxu0 %v713_v2 }
   0xc   :  { %645 = vmatprep.subr.bf16.mxu0 %v714_v3  ;;  %710 = vmatpush3.bf16.msra.mxu1 %v707_v21 }
   0xf   :  { %646 = vmatpush3.bf16.msra.mxu0 %v714_v3 }
  0x10   :  { %647 = vmatprep.subr.bf16.mxu0 %v715_v5 }
  0x13   :  { %648 = vmatpush3.bf16.msra.mxu0 %v715_v5 }
  0x14   :  { %649 = vmatprep.subr.bf16.mxu0 %v716_v6 }
  0x17   :  { %650 = vmatpush3.bf16.msra.mxu0 %v716_v6 }
  0x18   :  { %651 = vmatprep.subr.bf16.mxu0 %v717_v10 }
  0x1b   :  { %652 = vmatpush3.bf16.msra.mxu0 %v717_v10 }
  0x1c   :  { %653 = vmatprep.subr.bf16.mxu0 %v718_v11 }
  0x1f   :  { %654 = vmatpush3.bf16.msra.mxu0 %v718_v11 }
  0x22   :  { %656 = vmatmul.mubr.bf16.vlgmr.msra.gmra.mrb[0].mxu0 %v720_v12 }
  0x23   :  { %659 = vmatprep.mubr.bf16.mxu0 %v721_v13 }
  0x2a   :  { %660 = vmatmul.mubr.bf16.gmra.mrb[4].mxu0 %v722_v14 }
  0x2b   :  { %663 = vmatprep.mubr.bf16.mxu0 %v723_v15 }
  0x32   :  { %664 = vmatmul.mubr.bf16.gmra.mrb[8].mxu0 %v724_v16 }
  0x33   :  { %667 = vmatprep.mubr.bf16.mxu0 %v725_v17 }
  0x3a   :  { %668 = vmatmul.mubr.bf16.gmra.mrb[12].mxu0 %v726_v18 }
  0xf5   :  { %v657_v22 = vpop.f32.mrb[0].mxu0 }
  0xf6   :  { %v177_v23 = vpop.f32.mrb[1].mxu0 }
  0xf7   :  { %v658_v24 = vpop.f32.mrb[2].mxu0  ;;  %679 = vmatprep.mubr.msk.f32.mxu1 %vm244_vm0, %v177_v23 }
  0xf8   :  { %v180_v25 = vpop.f32.mrb[3].mxu0 }
  0xf9   :  { %680 = vmatmul.mubr.msk.f32.vlgmr.msra.gmra.mrb[0].mxu1 %vm244_vm0, %v180_v25 }
  0xfa   :  { %682 = vmatprep.mubr.msk.f32.mxu1 %vm244_vm0, %v657_v22 }
  0xfd   :  { %v661_v26 = vpop.f32.mrb[4].mxu0  ;;  %683 = vmatmul.mubr.msk.f32.gmra.mrb[2].mxu1 %vm244_vm0, %v658_v24 }
  0xfe   :  { %v193_v27 = vpop.f32.mrb[5].mxu0 }
  0xff   :  { %v662_v28 = vpop.f32.mrb[6].mxu0  ;;  %685 = vmatprep.mubr.msk.f32.mxu1 %vm244_vm0, %v193_v27 }
 0x100   :  { %v196_v29 = vpop.f32.mrb[7].mxu0 }
 0x101   :  { %686 = vmatmul.mubr.msk.f32.gmra.mrb[4].mxu1 %vm244_vm0, %v196_v29 }
 0x102   :  { %688 = vmatprep.mubr.msk.f32.mxu1 %vm244_vm0, %v661_v26 }
 0x105   :  { %v665_v30 = vpop.f32.mrb[8].mxu0  ;;  %689 = vmatmul.mubr.msk.f32.gmra.mrb[6].mxu1 %vm244_vm0, %v662_v28 }
 0x106   :  { %v209_v31 = vpop.f32.mrb[9].mxu0 }
 0x107   :  { %v666_v32 = vpop.f32.mrb[10].mxu0  ;;  %691 = vmatprep.mubr.msk.f32.mxu1 %vm244_vm0, %v209_v31 }
 0x108   :  { %v212_v33 = vpop.f32.mrb[11].mxu0 }
 0x109   :  { %692 = vmatmul.mubr.msk.f32.gmra.mrb[8].mxu1 %vm244_vm0, %v212_v33 }
 0x10a   :  { %694 = vmatprep.mubr.msk.f32.mxu1 %vm244_vm0, %v665_v30 }
 0x10d   :  { %v669_v34 = vpop.f32.mrb[12].mxu0  ;;  %695 = vmatmul.mubr.msk.f32.gmra.mrb[10].mxu1 %vm244_vm0, %v666_v32 }
 0x10e   :  { %v225_v35 = vpop.f32.mrb[13].mxu0 }
 0x10f   :  { %v670_v36 = vpop.f32.mrb[14].mxu0  ;;  %697 = vmatprep.mubr.msk.f32.mxu1 %vm244_vm0, %v225_v35 }
 0x110   :  { %v228_v37 = vpop.f32.mrb[15].mxu0 }
 0x111   :  { %698 = vmatmul.mubr.msk.f32.gmra.mrb[12].mxu1 %vm244_vm0, %v228_v37 }
 0x112   :  { %700 = vmatprep.mubr.msk.f32.mxu1 %vm244_vm0, %v669_v34 }
 0x115   :  { %701 = vmatmul.mubr.msk.f32.gmra.mrb[14].mxu1 %vm244_vm0, %v670_v36 }
 0x1cc   :  { %v681_v38 = vpop.f32.mrb[0].mxu1 }
 0x1cd   :  { %v439_v39 = vmax.f32 %v681_v38, 0.0  ;;  %v359_v40 = vpop.f32.mrb[1].mxu1 }
 0x1ce   :  { %v438_v41 = vmax.f32 %v359_v40, 0.0 }
 0x1cf   :  { %v588_v42 = vpack.c.bf16 %v439_v39, %v439_v39 }
 0x1d0   :  { %v587_v43 = vpack.c.bf16 %v438_v41, %v438_v41  ;;  %v684_v44 = vpop.f32.mrb[2].mxu1 }
 0x1d1   :  { %520 = vst.msk [vmem:[%s890_s3 + $0x4] sm:$0xf] %vm518_vm1, %v588_v42  ;;  %v441_v45 = vmax.f32 %v684_v44, 0.0  ;;  %v369_v46 = vpop.f32.mrb[3].mxu1 }
 0x1d2   :  { %519 = vst.msk [vmem:[%s890_s3] sm:$0xf] %vm518_vm1, %v587_v43  ;;  %v440_v47 = vmax.f32 %v369_v46, 0.0 }
 0x1d3   :  { %v590_v48 = vpack.c.bf16 %v441_v45, %v441_v45 }
 0x1d4   :  { %v589_v49 = vpack.c.bf16 %v440_v47, %v440_v47  ;;  %v687_v50 = vpop.f32.mrb[4].mxu1 }
 0x1d5   :  { %522 = vst.msk [vmem:[%s890_s3 + $0xc] sm:$0xf] %vm518_vm1, %v590_v48  ;;  %v443_v51 = vmax.f32 %v687_v50, 0.0  ;;  %v379_v52 = vpop.f32.mrb[5].mxu1 }
 0x1d6   :  { %521 = vst.msk [vmem:[%s890_s3 + $0x8] sm:$0xf] %vm518_vm1, %v589_v49  ;;  %v442_v53 = vmax.f32 %v379_v52, 0.0 }
 0x1d7   :  { %v592_v54 = vpack.c.bf16 %v443_v51, %v443_v51 }
 0x1d8   :  { %v591_v55 = vpack.c.bf16 %v442_v53, %v442_v53  ;;  %v690_v56 = vpop.f32.mrb[6].mxu1 }
 0x1d9   :  { %524 = vst.msk [vmem:[%s890_s3 + $0x14] sm:$0xf] %vm518_vm1, %v592_v54  ;;  %v445_v57 = vmax.f32 %v690_v56, 0.0  ;;  %v389_v58 = vpop.f32.mrb[7].mxu1 }
 0x1da   :  { %523 = vst.msk [vmem:[%s890_s3 + $0x10] sm:$0xf] %vm518_vm1, %v591_v55  ;;  %v444_v59 = vmax.f32 %v389_v58, 0.0 }
 0x1db   :  { %v594_v60 = vpack.c.bf16 %v445_v57, %v445_v57 }
 0x1dc   :  { %v593_v61 = vpack.c.bf16 %v444_v59, %v444_v59  ;;  %v693_v62 = vpop.f32.mrb[8].mxu1 }
 0x1dd   :  { %526 = vst.msk [vmem:[%s890_s3 + $0x1c] sm:$0xf] %vm518_vm1, %v594_v60  ;;  %v447_v63 = vmax.f32 %v693_v62, 0.0  ;;  %v399_v0 = vpop.f32.mrb[9].mxu1 }
 0x1de   :  { %525 = vst.msk [vmem:[%s890_s3 + $0x18] sm:$0xf] %vm518_vm1, %v593_v61  ;;  %v446_v1 = vmax.f32 %v399_v0, 0.0 }
 0x1df   :  { %v596_v2 = vpack.c.bf16 %v447_v63, %v447_v63 }
 0x1e0   :  { %v595_v3 = vpack.c.bf16 %v446_v1, %v446_v1  ;;  %v696_v4 = vpop.f32.mrb[10].mxu1 }
 0x1e1   :  { %528 = vst.msk [vmem:[%s890_s3 + $0x24] sm:$0xf] %vm518_vm1, %v596_v2  ;;  %v449_v5 = vmax.f32 %v696_v4, 0.0  ;;  %v409_v6 = vpop.f32.mrb[11].mxu1 }
 0x1e2   :  { %527 = vst.msk [vmem:[%s890_s3 + $0x20] sm:$0xf] %vm518_vm1, %v595_v3  ;;  %v448_v7 = vmax.f32 %v409_v6, 0.0 }
 0x1e3   :  { %v598_v8 = vpack.c.bf16 %v449_v5, %v449_v5 }
 0x1e4   :  { %v597_v9 = vpack.c.bf16 %v448_v7, %v448_v7  ;;  %v699_v10 = vpop.f32.mrb[12].mxu1 }
 0x1e5   :  { %530 = vst.msk [vmem:[%s890_s3 + $0x2c] sm:$0xf] %vm518_vm1, %v598_v8  ;;  %v451_v11 = vmax.f32 %v699_v10, 0.0  ;;  %v419_v12 = vpop.f32.mrb[13].mxu1 }
 0x1e6   :  { %529 = vst.msk [vmem:[%s890_s3 + $0x28] sm:$0xf] %vm518_vm1, %v597_v9  ;;  %v450_v13 = vmax.f32 %v419_v12, 0.0 }
 0x1e7   :  { %v600_v14 = vpack.c.bf16 %v451_v11, %v451_v11 }
 0x1e8   :  { %v599_v15 = vpack.c.bf16 %v450_v13, %v450_v13  ;;  %v702_v16 = vpop.f32.mrb[14].mxu1 }
 0x1e9   :  { %532 = vst.msk [vmem:[%s890_s3 + $0x34] sm:$0xf] %vm518_vm1, %v600_v14  ;;  %v453_v17 = vmax.f32 %v702_v16, 0.0  ;;  %v429_v18 = vpop.f32.mrb[15].mxu1 }
 0x1ea   :  { %531 = vst.msk [vmem:[%s890_s3 + $0x30] sm:$0xf] %vm518_vm1, %v599_v15  ;;  %v452_v19 = vmax.f32 %v429_v18, 0.0 }
 0x1eb   :  { %v602_v20 = vpack.c.bf16 %v453_v17, %v453_v17 }
 0x1ec   :  { %v601_v21 = vpack.c.bf16 %v452_v19, %v452_v19 }
 0x1ed   :  { %534 = vst.msk [vmem:[%s890_s3 + $0x3c] sm:$0xf] %vm518_vm1, %v602_v20 }
 0x1ee   :  { %533 = vst.msk [vmem:[%s890_s3 + $0x38] sm:$0xf] %vm518_vm1, %v601_v21 }

</bundles_post_ra>
